<compile_context>
chip_gen: v7x
topology: tpu7x:2x2x1
jax: 0.10.0
libtpu: 0.0.40
codegen_flags: <defaults>
</compile_context>

<pallas_src>
import functools

import jax
import jax.numpy as jnp
from jax.experimental import pallas as pl
from jax.experimental.pallas import tpu as pltpu

DROPOUT_P = 0.5
N_EMBD = 64
LANES = 128


def _ffn_kernel(seed_ref,                                   # scalar-prefetch (SMEM): [seed]
                x_ref, w1_ref, b1_ref, w2_ref, b2_ref,      # inputs (VMEM)
                o_ref,                                      # output (VMEM), lane-padded
                *, dropout_p, training):
    # ---- matmul -> ReLU -> matmul (f32 accumulation on the MXU) ----
    x = x_ref[...]                                                     # (tm, C)
    h = jnp.dot(x, w1_ref[...], preferred_element_type=jnp.float32)
    h = jnp.maximum(h + b1_ref[...], 0.0)                              # (tm, H), f32 elementwise
    y = jnp.dot(h.astype(w2_ref.dtype), w2_ref[...],
                preferred_element_type=jnp.float32)
    y = y + b2_ref[...]                                                # (tm, Cp), f32

    # ---- Dropout (training only; statically compiled out in eval mode) ----
    # PyTorch dropout is stochastic; we reproduce the semantics (Bernoulli keep
    # mask, scale by 1/(1-p)) with a counter-based hash PRNG keyed on
    # (seed, global element index) so every row-tile gets a distinct mask.
    if training and dropout_p > 0.0:
        tm, cp = y.shape
        row0 = (pl.program_id(0) * tm).astype(jnp.uint32)
        rows = jax.lax.broadcasted_iota(jnp.uint32, (tm, cp), 0) + row0
        cols = jax.lax.broadcasted_iota(jnp.uint32, (tm, cp), 1)
        ctr = rows * jnp.uint32(cp) + cols
        seed = seed_ref[0].astype(jnp.uint32)
        v = ctr ^ (seed * jnp.uint32(0x9E3779B9))
        # lowbias32 finalizer: good avalanche, pure 32-bit VPU ops.
        v = v ^ (v >> 16)
        v = v * jnp.uint32(0x7FEB352D)
        v = v ^ (v >> 15)
        v = v * jnp.uint32(0x846CA68B)
        v = v ^ (v >> 16)
        keep_prob = 1.0 - dropout_p
        # clamp so keep_prob -> 1.0 can't overflow uint32
        thresh = jnp.uint32(min(int(round(keep_prob * 4294967296.0)), 4294967295))
        keep = v < thresh
        y = jnp.where(keep, y * jnp.float32(1.0 / keep_prob), jnp.float32(0.0))

    o_ref[...] = y.astype(o_ref.dtype)


def feedforward(x, w1, b1, w2, b2, *, dropout_p=DROPOUT_P, training=True, seed=0,
                compute_dtype=jnp.bfloat16, tile_m=512):
    """x: (B, T, C) float32.  Returns (B, T, C).

    compute_dtype controls the MXU operand dtype (bf16 default for speed,
    float32 for bit-faithful PyTorch numerics).  Accumulation is always f32.
    """
    assert 0.0 <= dropout_p < 1.0
    B, T, C = x.shape
    H = w1.shape[1]                      # 4*C
    M = B * T
    Cp = ((C + LANES - 1) // LANES) * LANES   # lane-dense output width (>= 128)

    # Row tiling: big enough to amortize per-step overhead, sublane aligned.
    tile_m = min(tile_m, M)
    if tile_m != M:
        tile_m = max(8, (tile_m // 8) * 8)
    grid_m = pl.cdiv(M, tile_m)

    x2d = x.reshape(M, C).astype(compute_dtype)
    w1c = w1.astype(compute_dtype)
    b1_2d = b1.reshape(1, H).astype(jnp.float32)
    # Zero-pad the second matmul's output width to Cp lanes.
    w2p = jnp.zeros((H, Cp), compute_dtype).at[:, :C].set(w2.astype(compute_dtype))
    b2p = jnp.zeros((1, Cp), jnp.float32).at[:, :C].set(b2.astype(jnp.float32))
    scalars = jnp.array([seed], dtype=jnp.int32)

    kernel = functools.partial(_ffn_kernel,
                               dropout_p=float(dropout_p),
                               training=bool(training))

    isz = jnp.dtype(compute_dtype).itemsize
    cost = pl.CostEstimate(
        flops=2 * M * C * H + 2 * M * H * Cp,
        transcendentals=0,
        bytes_accessed=(M * C * isz + M * Cp * x.dtype.itemsize
                        + (C * H + H * Cp) * isz + (H + Cp) * 4),
    )

    out2d = pl.pallas_call(
        kernel,
        out_shape=jax.ShapeDtypeStruct((M, Cp), x.dtype),
        grid_spec=pltpu.PrefetchScalarGridSpec(
            num_scalar_prefetch=1,
            grid=(grid_m,),
            in_specs=[
                pl.BlockSpec((tile_m, C), lambda i, s: (i, 0)),   # x tile
                pl.BlockSpec((C, H), lambda i, s: (0, 0)),        # w1 (resident)
                pl.BlockSpec((1, H), lambda i, s: (0, 0)),        # b1 (resident)
                pl.BlockSpec((H, Cp), lambda i, s: (0, 0)),       # w2 padded (resident)
                pl.BlockSpec((1, Cp), lambda i, s: (0, 0)),       # b2 padded (resident)
            ],
            out_specs=pl.BlockSpec((tile_m, Cp), lambda i, s: (i, 0)),
        ),
        compiler_params=pltpu.CompilerParams(
            dimension_semantics=("parallel",),          # megacore sharding on v7x
            vmem_limit_bytes=32 * 1024 * 1024,          # safe scoped limit on v5e/v6e/v7x
        ),
        cost_estimate=cost,
    )(scalars, x2d, w1c, b1_2d, w2p, b2p)

    return out2d[:, :C].reshape(B, T, C)


def init_params(key, n_embd):
    """Deterministic init matching PyTorch nn.Linear default (U[-1/sqrt(fan_in), 1/sqrt(fan_in)])."""
    h = 4 * n_embd
    k1, k2, k3, k4 = jax.random.split(key, 4)
    bound1 = 1.0 / jnp.sqrt(n_embd)
    bound2 = 1.0 / jnp.sqrt(h)
    w1 = jax.random.uniform(k1, (n_embd, h), jnp.float32, -bound1, bound1)
    b1 = jax.random.uniform(k2, (h,), jnp.float32, -bound1, bound1)
    w2 = jax.random.uniform(k3, (h, n_embd), jnp.float32, -bound2, bound2)
    b2 = jax.random.uniform(k4, (n_embd,), jnp.float32, -bound2, bound2)
    return w1, b1, w2, b2


if __name__ == "__main__":
    key = jax.random.PRNGKey(0)
    kx, kp = jax.random.split(key)

    B, T, C = 2, 8, N_EMBD                      # small shapes: batch=2, seq=8, n_embd=64
    x = jax.random.normal(kx, (B, T, C), dtype=jnp.float32)
    w1, b1, w2, b2 = init_params(kp, C)

    # Training mode (dropout on), default bf16 MXU path.
    out_train = jax.block_until_ready(
        feedforward(x, w1, b1, w2, b2, training=True, seed=1234))
    assert out_train.shape == (B, T, C)
    assert bool(jnp.all(jnp.isfinite(out_train)))
    # ~50% of entries should be zeroed by dropout (p = 0.5).
    frac_zero = float(jnp.mean((out_train == 0.0).astype(jnp.float32)))
    assert 0.25 < frac_zero < 0.75, f"dropout fraction off: {frac_zero}"

    # Eval mode, f32 compute path must match the pure-JAX reference exactly.
    out_eval = jax.block_until_ready(
        feedforward(x, w1, b1, w2, b2, training=False, compute_dtype=jnp.float32))
    ref = (jnp.maximum(x.reshape(-1, C) @ w1 + b1, 0.0) @ w2 + b2).reshape(B, T, C)
    assert jnp.allclose(out_eval, ref, atol=1e-4, rtol=1e-4)

    # Eval mode, bf16 MXU path: sanity check against the f32 reference.
    out_eval_bf16 = jax.block_until_ready(
        feedforward(x, w1, b1, w2, b2, training=False))
    assert jnp.allclose(out_eval_bf16, ref, atol=2.5e-1, rtol=5e-2)

    print("KERNEL_OK")
</pallas_src>

<mosaic_0001>
module attributes {stable_mosaic.version = 11 : i64} {
  func.func @_ffn_kernel(%arg0: i32, %arg1: memref<1xi32, #tpu.memory_space<smem>>, %arg2: memref<16x64xbf16, #tpu.memory_space<vmem>>, %arg3: memref<64x256xbf16, #tpu.memory_space<vmem>>, %arg4: memref<1x256xf32, #tpu.memory_space<vmem>>, %arg5: memref<256x128xbf16, #tpu.memory_space<vmem>>, %arg6: memref<1x128xf32, #tpu.memory_space<vmem>>, %arg7: memref<16x128xf32, #tpu.memory_space<vmem>>) attributes {dimension_semantics = [#tpu.dimension_semantics<parallel>], iteration_bounds = array<i64: 1>, scalar_prefetch = 1 : i64, scratch_operands = 0 : i64, tpu.core_type = #tpu.core_type<tc>, window_params = [{transform_indices = @transform_0, window_bounds = array<i64: 16, 64>}, {pipeline_mode = #tpu.pipeline_mode<synchronous>, transform_indices = @transform_1, window_bounds = array<i64: 64, 256>}, {pipeline_mode = #tpu.pipeline_mode<synchronous>, transform_indices = @transform_2, window_bounds = array<i64: 1, 256>}, {pipeline_mode = #tpu.pipeline_mode<synchronous>, transform_indices = @transform_3, window_bounds = array<i64: 256, 128>}, {pipeline_mode = #tpu.pipeline_mode<synchronous>, transform_indices = @transform_4, window_bounds = array<i64: 1, 128>}, {transform_indices = @transform_5, window_bounds = array<i64: 16, 128>}]} {
    %c0 = arith.constant 0 : index
    %c0_0 = arith.constant 0 : index
    %0 = vector.load %arg2[%c0, %c0_0] : memref<16x64xbf16, #tpu.memory_space<vmem>>, vector<16x64xbf16>
    %c0_1 = arith.constant 0 : index
    %c0_2 = arith.constant 0 : index
    %1 = vector.load %arg3[%c0_1, %c0_2] : memref<64x256xbf16, #tpu.memory_space<vmem>>, vector<64x256xbf16>
    %cst = arith.constant dense<0.000000e+00> : vector<16x256xf32>
    %2 = tpu.matmul %0, %1, %cst {dimension_numbers = #tpu.dot_dimension_numbers<[1], [0], [0], [1], [0, 0, 1, 1], [], []>} : vector<16x64xbf16>, vector<64x256xbf16>, vector<16x256xf32> -> vector<16x256xf32>
    %c0_3 = arith.constant 0 : index
    %c0_4 = arith.constant 0 : index
    %3 = vector.load %arg4[%c0_3, %c0_4] : memref<1x256xf32, #tpu.memory_space<vmem>>, vector<1x256xf32>
    %4 = vector.broadcast %3 : vector<1x256xf32> to vector<16x256xf32>
    %5 = arith.addf %2, %4 : vector<16x256xf32>
    %cst_5 = arith.constant 0.000000e+00 : f32
    %6 = vector.broadcast %cst_5 : f32 to vector<16x256xf32>
    %7 = arith.maximumf %5, %6 : vector<16x256xf32>
    %8 = arith.truncf %7 : vector<16x256xf32> to vector<16x256xbf16>
    %c0_6 = arith.constant 0 : index
    %c0_7 = arith.constant 0 : index
    %9 = vector.load %arg5[%c0_6, %c0_7] : memref<256x128xbf16, #tpu.memory_space<vmem>>, vector<256x128xbf16>
    %cst_8 = arith.constant dense<0.000000e+00> : vector<16x128xf32>
    %10 = tpu.matmul %8, %9, %cst_8 {dimension_numbers = #tpu.dot_dimension_numbers<[1], [0], [0], [1], [0, 0, 1, 1], [], []>} : vector<16x256xbf16>, vector<256x128xbf16>, vector<16x128xf32> -> vector<16x128xf32>
    %c0_9 = arith.constant 0 : index
    %c0_10 = arith.constant 0 : index
    %11 = vector.load %arg6[%c0_9, %c0_10] : memref<1x128xf32, #tpu.memory_space<vmem>>, vector<1x128xf32>
    %12 = vector.broadcast %11 : vector<1x128xf32> to vector<16x128xf32>
    %13 = arith.addf %10, %12 : vector<16x128xf32>
    %c16_i32 = arith.constant 16 : i32
    %14 = arith.muli %arg0, %c16_i32 : i32
    %15 = tpu.iota {dimensions = array<i32: 0>} : vector<16x128xi32>
    %16 = vector.broadcast %14 : i32 to vector<16x128xi32>
    %17 = arith.addi %15, %16 : vector<16x128xi32>
    %18 = tpu.iota {dimensions = array<i32: 1>} : vector<16x128xi32>
    %c128_i32 = arith.constant 128 : i32
    %19 = vector.broadcast %c128_i32 : i32 to vector<16x128xi32>
    %20 = arith.muli %17, %19 : vector<16x128xi32>
    %21 = arith.addi %20, %18 : vector<16x128xi32>
    %c0_11 = arith.constant 0 : index
    %22 = memref.load %arg1[%c0_11] : memref<1xi32, #tpu.memory_space<smem>>
    %c-1640531527_i32 = arith.constant -1640531527 : i32
    %23 = arith.muli %22, %c-1640531527_i32 : i32
    %24 = vector.broadcast %23 : i32 to vector<16x128xi32>
    %25 = arith.xori %21, %24 : vector<16x128xi32>
    %c16_i32_12 = arith.constant 16 : i32
    %26 = vector.broadcast %c16_i32_12 : i32 to vector<16x128xi32>
    %27 = arith.shrui %25, %26 : vector<16x128xi32>
    %28 = arith.xori %25, %27 : vector<16x128xi32>
    %c2146121005_i32 = arith.constant 2146121005 : i32
    %29 = vector.broadcast %c2146121005_i32 : i32 to vector<16x128xi32>
    %30 = arith.muli %28, %29 : vector<16x128xi32>
    %c15_i32 = arith.constant 15 : i32
    %31 = vector.broadcast %c15_i32 : i32 to vector<16x128xi32>
    %32 = arith.shrui %30, %31 : vector<16x128xi32>
    %33 = arith.xori %30, %32 : vector<16x128xi32>
    %c-2073254261_i32 = arith.constant -2073254261 : i32
    %34 = vector.broadcast %c-2073254261_i32 : i32 to vector<16x128xi32>
    %35 = arith.muli %33, %34 : vector<16x128xi32>
    %c16_i32_13 = arith.constant 16 : i32
    %36 = vector.broadcast %c16_i32_13 : i32 to vector<16x128xi32>
    %37 = arith.shrui %35, %36 : vector<16x128xi32>
    %38 = arith.xori %35, %37 : vector<16x128xi32>
    %c-2147483648_i32 = arith.constant -2147483648 : i32
    %39 = vector.broadcast %c-2147483648_i32 : i32 to vector<16x128xi32>
    %40 = arith.cmpi ult, %38, %39 : vector<16x128xi32>
    %cst_14 = arith.constant 2.000000e+00 : f32
    %41 = vector.broadcast %cst_14 : f32 to vector<16x128xf32>
    %42 = arith.mulf %13, %41 : vector<16x128xf32>
    %cst_15 = arith.constant 0.000000e+00 : f32
    %43 = vector.broadcast %cst_15 : f32 to vector<16x128xf32>
    %44 = arith.select %40, %42, %43 : vector<16x128xi1>, vector<16x128xf32>
    %c0_16 = arith.constant 0 : index
    %c0_17 = arith.constant 0 : index
    %45 = vector.load %arg7[%c0_16, %c0_17] : memref<16x128xf32, #tpu.memory_space<vmem>>, vector<16x128xf32>
    tpu.vector_store %arg7[%c0_16, %c0_17], %44 {strides = array<i32>} : memref<16x128xf32, #tpu.memory_space<vmem>>, vector<16x128xf32>,
    return
  }
  func.func @transform_0(%arg0: i32, %arg1: memref<1xi32, #tpu.memory_space<smem>>) -> (i32, i32) {
    %c0_i32 = arith.constant 0 : i32
    %c0_i32_0 = arith.constant 0 : i32
    return %arg0, %c0_i32 : i32, i32
  }
  func.func @transform_1(%arg0: i32, %arg1: memref<1xi32, #tpu.memory_space<smem>>) -> (i32, i32) {
    %c0_i32 = arith.constant 0 : i32
    %c0_i32_0 = arith.constant 0 : i32
    %c0_i32_1 = arith.constant 0 : i32
    return %c0_i32, %c0_i32_0 : i32, i32
  }
  func.func @transform_2(%arg0: i32, %arg1: memref<1xi32, #tpu.memory_space<smem>>) -> (i32, i32) {
    %c0_i32 = arith.constant 0 : i32
    %c0_i32_0 = arith.constant 0 : i32
    %c0_i32_1 = arith.constant 0 : i32
    return %c0_i32, %c0_i32_0 : i32, i32
  }
  func.func @transform_3(%arg0: i32, %arg1: memref<1xi32, #tpu.memory_space<smem>>) -> (i32, i32) {
    %c0_i32 = arith.constant 0 : i32
    %c0_i32_0 = arith.constant 0 : i32
    %c0_i32_1 = arith.constant 0 : i32
    return %c0_i32, %c0_i32_0 : i32, i32
  }
  func.func @transform_4(%arg0: i32, %arg1: memref<1xi32, #tpu.memory_space<smem>>) -> (i32, i32) {
    %c0_i32 = arith.constant 0 : i32
    %c0_i32_0 = arith.constant 0 : i32
    %c0_i32_1 = arith.constant 0 : i32
    return %c0_i32, %c0_i32_0 : i32, i32
  }
  func.func @transform_5(%arg0: i32, %arg1: memref<1xi32, #tpu.memory_space<smem>>) -> (i32, i32) {
    %c0_i32 = arith.constant 0 : i32
    %c0_i32_0 = arith.constant 0 : i32
    return %arg0, %c0_i32 : i32, i32
  }
}

</mosaic_0001>

<bundles_post_ra>
// kernel: tpu_custom_call.1
= control target key start
LH: loop header
LB: loop body
LE: loop exit
PB: predicated region body
PF: predicated region fallthrough
CT: control target
= control target key end

     0   :  { %12 = vsyncpa [#allocation5], 0  ;;  %s709_s0 = inlined_call_operand.<no memory space> [shape: s32[1], index: 0, kind: input, shape index: {}]   ;;  %s710_s1 = inlined_call_operand.hbm [shape: bf16[16,64], index: 1, kind: input, shape index: {}]   ;;  %s711_s2 = inlined_call_operand.hbm [shape: bf16[64,256], index: 2, kind: input, shape index: {}]   ;;  %s712_s3 = inlined_call_operand.vmem [shape: f32[1,256], index: 3, kind: input, shape index: {}]   ;;  %s713_s4 = inlined_call_operand.hbm [shape: bf16[256,128], index: 4, kind: input, shape index: {}]   ;;  %s714_s5 = inlined_call_operand.vmem [shape: f32[1,128], index: 5, kind: input, shape index: {}]   ;;  %s715_s6 = inlined_call_operand.hbm [shape: f32[16,128], index: 6, kind: output, shape index: {}]  }
   0x1   :  { %13 = vsyncpa [#allocation8], 0 }
   0x2   :  { %14 = vsyncpa [#allocation6], 0  ;;  %s602_s21 = smov [#allocation7]   ;;  %s508_s25 = scalar_lea.hbm %s711_s2, 1024 }
   0x3   :  { %s32_s22 = sshll.u32 %s602_s21, 4  ;;  %p509_p0 = scmp.ne.s32.totalorder %s711_s2, %s508_s25  ;;  %s33_s22 = int_to_ptr.vmem [resolvable:$true] %s32_s22 }
   0x4   :  { %p512_p1 = scmp.lt.u32.totalorder %s508_s25, %s711_s2 }
   0x6   :  { %p514_p2 = pnand %p512_p1, %p509_p0 }
   0x8   :  { %517 = shalt.err (!%p514_p2)
}
   0x9   :  { %s518_s30 = scalar_lea.vmem %s33_s22, 1024  ;;  %p523_p4 = scmp.lt.s32.totalorder %s33_s22, %s33_s22 }
   0xa   :  { %p519_p3 = scmp.ne.s32.totalorder %s33_s22, %s518_s30  ;;  %p524_p5 = scmp.lt.s32.totalorder %s518_s30, %s518_s30 }
   0xc   :  { %p525_p6 = por %p524_p5, %p523_p4 }
   0xe   :  { %p526_p7 = pnand %p525_p6, %p519_p3 }
  0x10   :  { %529 = shalt.err (!%p526_p7)
}
  0x11   :  { %s603_s7 = smov 128   ;;  %s604_s8 = smov 8  }
  0x12   :  { %38 = dma.hbm_to_vmem [thread:$0]  %s711_s2, 1024, %s33_s22, [#allocation8], %s603_s7, %s603_s7, %s604_s8  }
  0x13   :  { %s605_s11 = smov [#allocation4]   ;;  %s530_s15 = scalar_lea.hbm %s710_s1, 128 }
  0x14   :  { %s20_s12 = sshll.u32 %s605_s11, 4  ;;  %p531_p8 = scmp.ne.s32.totalorder %s710_s1, %s530_s15  ;;  %s21_s12 = int_to_ptr.vmem [resolvable:$true] %s20_s12 }
  0x15   :  { %p534_p9 = scmp.lt.u32.totalorder %s530_s15, %s710_s1 }
  0x17   :  { %p536_p10 = pnand %p534_p9, %p531_p8 }
  0x19   :  { %539 = shalt.err (!%p536_p10)
}
  0x1a   :  { %s540_s20 = scalar_lea.vmem %s21_s12, 128  ;;  %p545_p12 = scmp.lt.s32.totalorder %s21_s12, %s21_s12 }
  0x1b   :  { %p541_p11 = scmp.ne.s32.totalorder %s21_s12, %s540_s20  ;;  %p546_p13 = scmp.lt.s32.totalorder %s540_s20, %s540_s20 }
  0x1d   :  { %p547_p0 = por %p546_p13, %p545_p12 }
  0x1f   :  { %p548_p1 = pnand %p547_p0, %p541_p11 }
  0x21   :  { %551 = shalt.err (!%p548_p1)
}
  0x22   :  { %s606_s2 = smov 64   ;;  %s607_s21 = smov 4  }
  0x23   :  { %26 = dma.hbm_to_vmem [thread:$0]  %s710_s1, 128, %s21_s12, [#allocation5], %s606_s2, %s606_s2, %s607_s21  }
  0x24   :  { %s608_s24 = smov [#allocation9]   ;;  %s552_s28 = scalar_lea.hbm %s713_s4, 2048 }
  0x25   :  { %s46_s25 = sshll.u32 %s608_s24, 4  ;;  %p553_p2 = scmp.ne.s32.totalorder %s713_s4, %s552_s28  ;;  %s47_s25 = int_to_ptr.vmem [resolvable:$true] %s46_s25 }
  0x26   :  { %p556_p3 = scmp.lt.u32.totalorder %s552_s28, %s713_s4 }
  0x28   :  { %p558_p4 = pnand %p556_p3, %p553_p2 }
  0x2a   :  { %561 = shalt.err (!%p558_p4)
}
  0x2b   :  { %s562_s11 = scalar_lea.vmem %s47_s25, 2048  ;;  %p567_p6 = scmp.lt.s32.totalorder %s47_s25, %s47_s25 }
  0x2c   :  { %p563_p5 = scmp.ne.s32.totalorder %s47_s25, %s562_s11  ;;  %p568_p7 = scmp.lt.s32.totalorder %s562_s11, %s562_s11 }
  0x2e   :  { %p569_p8 = por %p568_p7, %p567_p6 }
  0x30   :  { %p570_p9 = pnand %p569_p8, %p563_p5 }
  0x32   :  { %573 = shalt.err (!%p570_p9)
}
  0x33   :  { %52 = dma.hbm_to_vmem [thread:$0]  %s713_s4, 2048, %s47_s25, [#allocation8], %s606_s2, %s606_s2, %s607_s21  }
  0x34   :  { %596 = dma.done.wait [#allocation5], 128  }
  0x35   :  { %597 = vsyncadd [#allocation5], 4294967168 }
  0x36   :  { %598 = dma.done.wait [#allocation8], 3072  }
  0x37   :  { %599 = vsyncadd [#allocation8], 4294964224  ;;  %v609_v0 = vmov 0   ;;  %v479_v1 = vld [vmem:[#allocation7 + $0x4] ss:$8 sps:$4 sm:$0xff]   ;;  %v496_v13 = vld [vmem:[#allocation9 + $0x50] sm:$0xff]   ;;  %v77_v26 = vlaneseq }
  0x38   :  { %168 = vmatprep.mubr.bf16.mxu0 %v609_v0  ;;  %v481_v2 = vld [vmem:[#allocation7] ss:$8 sps:$4 sm:$0xff]   ;;  %136 = vmatprep.subr.bf16.mxu0 %v479_v1  ;;  %v482_v3 = vld [vmem:[#allocation7 + $0x14] ss:$8 sps:$4 sm:$0xff]   ;;  %v484_v4 = vld [vmem:[#allocation7 + $0x10] ss:$8 sps:$4 sm:$0xff]  }
  0x39   :  { %137 = vmatpush1.bf16.msra.mxu0 %v481_v2  ;;  %v485_v5 = vld [vmem:[#allocation7 + $0x24] ss:$8 sps:$4 sm:$0xff]   ;;  %v487_v6 = vld [vmem:[#allocation7 + $0x20] ss:$8 sps:$4 sm:$0xff]   ;;  %v488_v7 = vld [vmem:[#allocation7 + $0x34] ss:$8 sps:$4 sm:$0xff]  }
  0x3a   :  { %138 = vmatprep.subr.bf16.mxu0 %v482_v3  ;;  %v492_v8 = vld [vmem:[#allocation9 + $0x40] sm:$0xff]   ;;  %v490_v10 = vld [vmem:[#allocation7 + $0x30] ss:$8 sps:$4 sm:$0xff]   ;;  %v494_v11 = vld [vmem:[#allocation9 + $0x48] sm:$0xff]   ;;  %vm132_vm0 = vcmask 523264   ;;  %v78_v27 = vshrl.u32 %v77_v26, 7 }
  0x3b   :  { %v493_v9 = vld [vmem:[#allocation9] sm:$0xff]   ;;  %448 = vmatprep.subr.bf16.mxu1 %v492_v8  ;;  %v495_v12 = vld [vmem:[#allocation9 + $0x8] sm:$0xff]   ;;  %v491_v14 = vld [vmem:[#allocation4] sm:$0xff]   ;;  %v369_v48 = vand.u32 127, %v77_v26  ;;  %s375_s15 = smul.u32 2654435769, %s709_s0 }
  0x3c   :  { %449 = vmatpush3.bf16.msra.mxu1 %v493_v9  ;;  %v497_v15 = vld [vmem:[#allocation9 + $0x10] sm:$0xff]   ;;  %v498_v16 = vld [vmem:[#allocation9 + $0x58] sm:$0xff]   ;;  %v500_v18 = vld [vmem:[#allocation9 + $0x60] sm:$0xff]   ;;  %v79_v28 = vsub.s32 0, %v78_v27  ;;  %v83_v30 = vsub.s32 1, %v78_v27  ;;  %v364_v47 = vadd.s32 8, %v78_v27 }
  0x3d   :  { %139 = vmatpush1.bf16.msra.mxu0 %v484_v4  ;;  %450 = vmatprep.subr.bf16.mxu1 %v494_v11  ;;  %v499_v17 = vld [vmem:[#allocation9 + $0x18] sm:$0xff]   ;;  %v501_v19 = vld [vmem:[#allocation9 + $0x20] sm:$0xff]   ;;  %v502_v20 = vld [vmem:[#allocation9 + $0x68] sm:$0xff]   ;;  %v370_v49 = vmul.u32 128, %v78_v27  ;;  %v376_v52 = vstv %s375_s15  ;;  %s610_s17 = smov [#allocation10]  }
  0x3e   :  { %140 = vmatprep.subr.bf16.mxu0 %v485_v5  ;;  %v503_v21 = vld [vmem:[#allocation9 + $0x28] sm:$0xff]   ;;  %v504_v22 = vld [vmem:[#allocation9 + $0x70] sm:$0xff]   ;;  %v506_v24 = vld [vmem:[#allocation9 + $0x78] sm:$0xff]   ;;  %v371_v50 = vmul.u32 128, %v364_v47  ;;  %s408_s18 = sshll.u32 %s610_s17, 4  ;;  %s409_s18 = int_to_ptr.vmem [resolvable:$true] %s408_s18 }
  0x3f   :  { %v505_v23 = vld [vmem:[#allocation9 + $0x30] sm:$0xff]   ;;  %v507_v25 = vld [vmem:[#allocation9 + $0x38] sm:$0xff]   ;;  %v372_v51 = vadd.s32 %v370_v49, %v369_v48  ;;  %p579_p11 = scmp.lt.s32.totalorder %s409_s18, %s409_s18 }
  0x40   :  { %451 = vmatpush3.bf16.msra.mxu1 %v495_v12  ;;  %v75_v29 = vld [vmem:[%s712_s3] sm:$0x3]  ;;  %v373_v53 = vadd.s32 %v371_v50, %v369_v48 }
  0x41   :  { %141 = vmatpush1.bf16.msra.mxu0 %v487_v6  ;;  %452 = vmatprep.subr.bf16.mxu1 %v496_v13  ;;  %v80_v31 = vrot.slane %v75_v29, %v79_v28  ;;  %v84_v32 = vrot.slane %v75_v29, %v83_v30  ;;  %v377_v54 = vxor.u32 %v376_v52, %v372_v51 }
  0x42   :  { %142 = vmatprep.subr.bf16.mxu0 %v488_v7  ;;  %v378_v55 = vxor.u32 %v376_v52, %v373_v53  ;;  %v431_v7 = vld [vmem:[%s714_s5] ss:$0 sm:$0xff]  ;;  %s574_s5 = scalar_lea.vmem %s409_s18, 256 }
  0x43   :  { %v379_v56 = vshrl.u32 %v377_v54, 16  ;;  %p575_p10 = scmp.ne.s32.totalorder %s409_s18, %s574_s5  ;;  %p580_p12 = scmp.lt.s32.totalorder %s574_s5, %s574_s5 }
  0x44   :  { %453 = vmatpush3.bf16.msra.mxu1 %v497_v15  ;;  %v380_v57 = vshrl.u32 %v378_v55, 16 }
  0x45   :  { %143 = vmatpush1.bf16.msra.mxu0 %v490_v10  ;;  %454 = vmatprep.subr.bf16.mxu1 %v498_v16  ;;  %v381_v58 = vxor.u32 %v379_v56, %v377_v54  ;;  %p581_p13 = por %p580_p12, %p579_p11 }
  0x46   :  { %v382_v59 = vxor.u32 %v380_v57, %v378_v55 }
  0x47   :  { %v383_v60 = vmul.u32 2146121005, %v381_v58  ;;  %p582_p0 = pnand %p581_p13, %p575_p10 }
  0x48   :  { %430 = vmatmul.mubr.msk.bf16.vlgmr.msra.gmra.mrb[0].mxu0 %vm132_vm0, %v491_v14  ;;  %455 = vmatpush3.bf16.msra.mxu1 %v499_v17  ;;  %v384_v61 = vmul.u32 2146121005, %v382_v59 }
  0x49   :  { %456 = vmatprep.subr.bf16.mxu1 %v500_v18  ;;  %v385_v62 = vshrl.u32 %v383_v60, 15 }
  0x4a   :  { %v386_v63 = vshrl.u32 %v384_v61, 15 }
  0x4b   :  { %v387_v0 = vxor.u32 %v385_v62, %v383_v60 }
  0x4c   :  { %457 = vmatpush3.bf16.msra.mxu1 %v501_v19  ;;  %v388_v1 = vxor.u32 %v386_v63, %v384_v61 }
  0x4d   :  { %458 = vmatprep.subr.bf16.mxu1 %v502_v20  ;;  %v389_v2 = vmul.u32 2221713035, %v387_v0 }
  0x4e   :  { %v390_v3 = vmul.u32 2221713035, %v388_v1 }
  0x4f   :  { %v391_v4 = vshrl.u32 %v389_v2, 16 }
  0x50   :  { %459 = vmatpush3.bf16.msra.mxu1 %v503_v21  ;;  %v392_v5 = vshrl.u32 %v390_v3, 16 }
  0x51   :  { %460 = vmatprep.subr.bf16.mxu1 %v504_v22  ;;  %v393_v9 = vxor.u32 %v391_v4, %v389_v2 }
  0x52   :  { %v394_v13 = vxor.u32 %v392_v5, %v390_v3 }
  0x53   :  { %vm395_vm1 = vcmp.lt.u32.totalorder %v393_v9, 2147483648 }
  0x54   :  { %461 = vmatpush3.bf16.msra.mxu1 %v505_v23  ;;  %vm396_vm2 = vcmp.lt.u32.totalorder %v394_v13, 2147483648 }
  0x55   :  { %462 = vmatprep.subr.bf16.mxu1 %v506_v24 }
  0x58   :  { %463 = vmatpush3.bf16.msra.mxu1 %v507_v25 }
 0x11b   :  { %v170_v33 = vpop.f32.mrb[0].mxu0 }
 0x11c   :  { %v171_v34 = vadd.f32 %v170_v33, %v80_v31  ;;  %v172_v35 = vpop.f32.mrb[1].mxu0 }
 0x11d   :  { %v173_v36 = vadd.f32 %v172_v35, %v84_v32  ;;  %v174_v37 = vpop.f32.mrb[2].mxu0 }
 0x11e   :  { %v175_v38 = vadd.f32 %v174_v37, %v80_v31  ;;  %v176_v39 = vpop.f32.mrb[3].mxu0  ;;  %v179_v41 = vmax.f32 %v171_v34, 0.0 }
 0x11f   :  { %v177_v40 = vadd.f32 %v176_v39, %v84_v32  ;;  %v180_v43 = vmax.f32 %v173_v36, 0.0 }
 0x120   :  { %v181_v42 = vmax.f32 %v175_v38, 0.0 }
 0x121   :  { %v182_v44 = vmax.f32 %v177_v40, 0.0 }
 0x122   :  { %v183_v45 = vpack.c.bf16 %v181_v42, %v179_v41 }
 0x123   :  { %v184_v46 = vpack.c.bf16 %v182_v44, %v180_v43 }
 0x125   :  { %352 = vmatprep.mubr.bf16.mxu1 %v184_v46 }
 0x126   :  { %353 = vmatmul.mubr.bf16.vlgmr.msra.gmra.mrb[0].mxu1 %v183_v45 }
 0x1f9   :  { %v464_v6 = vpop.f32.mrb[0].mxu1 }
 0x1fa   :  { %v465_v8 = vpop.f32.mrb[1].mxu1 }
 0x1fb   :  { %v466_v10 = vadd.f32 %v465_v8, %v464_v6  ;;  %v467_v11 = vpop.f32.mrb[2].mxu1 }
 0x1fc   :  { %v468_v12 = vpop.f32.mrb[3].mxu1 }
 0x1fd   :  { %v355_v14 = vadd.f32 %v466_v10, %v431_v7  ;;  %v469_v15 = vadd.f32 %v468_v12, %v467_v11 }
 0x1ff   :  { %v397_v16 = vmul.f32 2.0, %v355_v14  ;;  %v358_v17 = vadd.f32 %v469_v15, %v431_v7 }
 0x201   :  { %v398_v18 = vmul.f32 2.0, %v358_v17  ;;  %v399_v19 = vsel %vm395_vm1, %v397_v16, 0.0 }
 0x202   :  { %401 = vst [vmem:[#allocation10] sm:$0xff] %v399_v19 }
 0x203   :  { %v400_v20 = vsel %vm396_vm2, %v398_v18, 0.0 }
 0x204   :  { %402 = vst [vmem:[#allocation10 + $0x8] sm:$0xff] %v400_v20 }
 0x205   :  { %585 = shalt.err (!%p582_p0)
}
 0x206   :  { %s586_s2 = scalar_lea.hbm %s715_s6, 256 }
 0x207   :  { %p587_p1 = scmp.ne.s32.totalorder %s715_s6, %s586_s2  ;;  %p590_p2 = scmp.lt.u32.totalorder %s586_s2, %s715_s6 }
 0x209   :  { %p592_p3 = pnand %p590_p2, %p587_p1 }
 0x20b   :  { %595 = shalt.err (!%p592_p3)
}
 0x20c   :  { %414 = dma.vmem_to_hbm [thread:$0]  %s409_s18, 256, %s715_s6, [#allocation6], %s603_s7, %s603_s7, %s604_s8  }
 0x20d   :  { %600 = dma.done.wait [#allocation6], 256  }
 0x20e   :  { %601 = vsyncadd [#allocation6], 4294967040 }
 0x20f   :  { %418 = vsyncpa [#allocation5], 1 }
 0x210   :  { %419 = vsyncpa [#allocation8], 1 }
 0x211   :  { %420 = vsyncpa [#allocation6], 1 }

</bundles_post_ra>
